<compile_context>
chip_gen: v7x
topology: tpu7x:2x2x1
jax: 0.10.0
libtpu: 0.0.40
codegen_flags: <defaults>
</compile_context>

<pallas_src>
import jax
import jax.numpy as jnp
from jax.experimental import pallas as pl
from jax.experimental.pallas import tpu as pltpu


def _round_up(x, m):
    return (x + m - 1) // m * m


def _cdiv(a, b):
    return -(-a // b)


def mlp_kernel(x_ref, w1_ref, b1_ref, w2_ref, b2_ref, o_ref):
    """One batch tile of Linear -> Dropout(identity) -> ReLU -> Linear -> Softmax.

    x_ref:  (TM, Din)     f32  (streamed per grid step)
    w1_ref: (Din, H_p)    bf16 (VMEM-resident; index_map == (0, 0))
    b1_ref: (1, H_p)      f32
    w2_ref: (H_p, Dout_p) bf16 (VMEM-resident)
    b2_ref: (1, Dout_p)   f32  (-1e30 in padded class columns)
    o_ref:  (TM, Dout_p)  bf16
    """
    # layer_input: cast f32 activations to bf16 on the fly (VPU, free vs HBM),
    # MXU matmul with f32 accumulation, f32 bias add.
    x = x_ref[...].astype(w1_ref.dtype)
    h = jnp.dot(x, w1_ref[...], preferred_element_type=jnp.float32) + b1_ref[...]

    # dropout: identity (inference / eval semantics)
    # TODO(synk): training-mode dropout (p=0.5 mask + 1/(1-p) rescale) would need
    #             pltpu.prng_seed / pltpu.prng_random_bits; eval mode is identity.

    # ReLU (VPU, f32)
    h = jnp.maximum(h, 0.0)

    # layer_hidden (cast h to bf16 for the MXU, accumulate f32)
    logits = jnp.dot(h.astype(w2_ref.dtype), w2_ref[...],
                     preferred_element_type=jnp.float32) + b2_ref[...]

    # softmax over dim=1 (numerically stable). Padded class columns carry -1e30
    # bias so their exp() is exactly 0; exact divide keeps row sums == 1.
    m = jnp.max(logits, axis=1, keepdims=True)
    e = jnp.exp(logits - m)
    p = e / jnp.sum(e, axis=1, keepdims=True)
    o_ref[...] = p.astype(o_ref.dtype)


def prepare_params(w1, b1, w2, b2):
    """Pad/cast the weights once (hoisted out of the per-call path)."""
    dim_in, dim_hidden = w1.shape
    dim_out = w2.shape[1]
    dh_p = _round_up(dim_hidden, 128)
    do_p = _round_up(dim_out, 128)
    w1_p = jnp.zeros((dim_in, dh_p), jnp.bfloat16).at[:, :dim_hidden].set(
        w1.astype(jnp.bfloat16))
    b1_p = jnp.zeros((1, dh_p), jnp.float32).at[0, :dim_hidden].set(
        b1.astype(jnp.float32))
    w2_p = jnp.zeros((dh_p, do_p), jnp.bfloat16).at[:dim_hidden, :dim_out].set(
        w2.astype(jnp.bfloat16))
    # -1e30 in padded class columns -> exp underflows to exactly 0 in the softmax.
    b2_p = jnp.full((1, do_p), -1e30, jnp.float32).at[0, :dim_out].set(
        b2.astype(jnp.float32))
    return w1_p, b1_p, w2_p, b2_p


def _choose_tm(b_rows, tm_cap):
    """Batch tile: biggest tile under tm_cap rows, >=2 tiles once the batch is
    large (so both v7x TensorCores get work), <8 wasted pad rows per tile."""
    if b_rows <= 256:
        return b_rows                      # one tile; per-step overhead irrelevant
    n_tiles = max(2, _cdiv(b_rows, tm_cap))
    return _round_up(_cdiv(b_rows, n_tiles), 8)


def mlp_forward(x_nchw, w1_p, b1_p, w2_p, b2_p, *, dim_out, tm=None, tm_cap=1024):
    """x_nchw: (B, C, H, W) float32. Returns softmax probs (B, dim_out) bfloat16."""
    B = x_nchw.shape[0]
    dim_in = x_nchw.shape[1] * x_nchw.shape[-2] * x_nchw.shape[-1]
    assert w1_p.shape[0] == dim_in
    dh_p = w1_p.shape[1]
    do_p = w2_p.shape[1]

    # ---- batch tiling (only padding is a handful of batch rows) ----
    b_rows = _round_up(B, 8)
    if tm is None:
        tm = _choose_tm(b_rows, tm_cap)
    tm = max(8, min(_round_up(tm, 8), b_rows))
    b_pad = _round_up(b_rows, tm)
    n_tiles = b_pad // tm

    x2d = x_nchw.reshape(B, dim_in).astype(jnp.float32)
    if b_pad != B:
        x2d = jnp.pad(x2d, ((0, b_pad - B), (0, 0)))

    # Deeper buffering on the one streamed input only when the grid is deep
    # enough for it to matter; resident weights never re-DMA so they stay default.
    x_spec_kwargs = {}
    if n_tiles >= 3:
        x_spec_kwargs["pipeline_mode"] = pl.Buffered(3)
    x_spec = pl.BlockSpec((tm, dim_in), lambda i: (i, 0), **x_spec_kwargs)

    cost = pl.CostEstimate(
        flops=2 * b_pad * (dim_in * dh_p + dh_p * do_p),
        transcendentals=b_pad * do_p,
        bytes_accessed=(b_pad * dim_in * 4            # x read (f32)
                        + dim_in * dh_p * 2           # W1 (bf16)
                        + dh_p * do_p * 2             # W2 (bf16)
                        + (dh_p + do_p) * 4           # biases (f32)
                        + b_pad * do_p * 2),          # out write (bf16)
    )

    out_p = pl.pallas_call(
        mlp_kernel,
        out_shape=jax.ShapeDtypeStruct((b_pad, do_p), jnp.bfloat16),
        grid_spec=pltpu.PrefetchScalarGridSpec(
            num_scalar_prefetch=0,
            grid=(n_tiles,),
            in_specs=[
                x_spec,                                         # x: streamed per tile
                pl.BlockSpec((dim_in, dh_p), lambda i: (0, 0)),  # W1: resident
                pl.BlockSpec((1, dh_p), lambda i: (0, 0)),       # b1: resident
                pl.BlockSpec((dh_p, do_p), lambda i: (0, 0)),    # W2: resident
                pl.BlockSpec((1, do_p), lambda i: (0, 0)),       # b2: resident
            ],
            out_specs=pl.BlockSpec((tm, do_p), lambda i: (i, 0)),
        ),
        compiler_params=pltpu.CompilerParams(
            dimension_semantics=("parallel",),   # batch tiles independent -> both TCs on v7x
            vmem_limit_bytes=32 * 1024 * 1024,   # v5e default is only 16 MiB
        ),
        cost_estimate=cost,
    )(x2d, w1_p, b1_p, w2_p, b2_p)

    # Strip batch / class padding.
    return out_p[:B, :dim_out]


def init_params(key, dim_in, dim_hidden, dim_out):
    # Deterministic init mimicking nn.Linear's uniform(-1/sqrt(fan_in), 1/sqrt(fan_in))
    k1, k2, k3, k4 = jax.random.split(key, 4)
    lim1 = 1.0 / jnp.sqrt(dim_in)
    lim2 = 1.0 / jnp.sqrt(dim_hidden)
    w1 = jax.random.uniform(k1, (dim_in, dim_hidden), jnp.float32, -lim1, lim1)
    b1 = jax.random.uniform(k2, (dim_hidden,), jnp.float32, -lim1, lim1)
    w2 = jax.random.uniform(k3, (dim_hidden, dim_out), jnp.float32, -lim2, lim2)
    b2 = jax.random.uniform(k4, (dim_out,), jnp.float32, -lim2, lim2)
    return w1, b1, w2, b2


if __name__ == "__main__":
    # Shapes consistent with the module: C*H*W = 4*14*14 = 784 = dim_in (default).
    B, C, H, W = 2, 4, 14, 14
    dim_in, dim_hidden, dim_out = C * H * W, 64, 10

    key = jax.random.PRNGKey(0)
    kx, kp, kx2 = jax.random.split(key, 3)
    x = jax.random.normal(kx, (B, C, H, W), dtype=jnp.float32)
    w1, b1, w2, b2 = init_params(kp, dim_in, dim_hidden, dim_out)
    params = prepare_params(w1, b1, w2, b2)   # hoisted: done once, reused per call

    def reference(x_nchw):
        # Same rounding as the kernel: bf16 operands, f32 accumulation, dropout=identity.
        x2d = x_nchw.reshape(-1, dim_in)
        xb = x2d.astype(jnp.bfloat16).astype(jnp.float32)
        w1f = w1.astype(jnp.bfloat16).astype(jnp.float32)
        w2f = w2.astype(jnp.bfloat16).astype(jnp.float32)
        h = jnp.maximum(xb @ w1f + b1, 0.0)
        logits = h.astype(jnp.bfloat16).astype(jnp.float32) @ w2f + b2
        return jax.nn.softmax(logits, axis=1)

    # --- small batch: single tile, exercises batch padding (2 -> 8 rows) ---
    out = mlp_forward(x, *params, dim_out=dim_out)
    out = jax.block_until_ready(out).astype(jnp.float32)
    assert out.shape == (B, dim_out)
    ref = reference(x)
    assert jnp.allclose(out, ref, atol=5e-3, rtol=5e-3)          # bf16 output rounding
    assert jnp.allclose(jnp.sum(out, axis=1), 1.0, atol=1e-2)

    # --- large batch: 3-tile grid, Buffered(3) x-stream, >=2 tiles for v7x TCs ---
    B2 = 2600
    x2 = jax.random.normal(kx2, (B2, C, H, W), dtype=jnp.float32)
    out2 = mlp_forward(x2, *params, dim_out=dim_out)
    out2 = jax.block_until_ready(out2).astype(jnp.float32)
    assert out2.shape == (B2, dim_out)
    ref2 = reference(x2)
    assert jnp.allclose(out2, ref2, atol=5e-3, rtol=5e-3)
    assert jnp.allclose(jnp.sum(out2, axis=1), 1.0, atol=1e-2)

    print("KERNEL_OK")
</pallas_src>

<mosaic_0001>
module attributes {stable_mosaic.version = 11 : i64} {
  func.func @mlp_kernel(%arg0: i32, %arg1: memref<8x784xf32, #tpu.memory_space<vmem>>, %arg2: memref<784x128xbf16, #tpu.memory_space<vmem>>, %arg3: memref<1x128xf32, #tpu.memory_space<vmem>>, %arg4: memref<128x128xbf16, #tpu.memory_space<vmem>>, %arg5: memref<1x128xf32, #tpu.memory_space<vmem>>, %arg6: memref<8x128xbf16, #tpu.memory_space<vmem>>) attributes {dimension_semantics = [#tpu.dimension_semantics<parallel>], iteration_bounds = array<i64: 1>, scalar_prefetch = 0 : i64, scratch_operands = 0 : i64, tpu.core_type = #tpu.core_type<tc>, window_params = [{transform_indices = @transform_0, window_bounds = array<i64: 8, 784>}, {pipeline_mode = #tpu.pipeline_mode<synchronous>, transform_indices = @transform_1, window_bounds = array<i64: 784, 128>}, {pipeline_mode = #tpu.pipeline_mode<synchronous>, transform_indices = @transform_2, window_bounds = array<i64: 1, 128>}, {pipeline_mode = #tpu.pipeline_mode<synchronous>, transform_indices = @transform_3, window_bounds = array<i64: 128, 128>}, {pipeline_mode = #tpu.pipeline_mode<synchronous>, transform_indices = @transform_4, window_bounds = array<i64: 1, 128>}, {transform_indices = @transform_5, window_bounds = array<i64: 8, 128>}]} {
    %c0 = arith.constant 0 : index
    %c0_0 = arith.constant 0 : index
    %0 = vector.load %arg1[%c0, %c0_0] : memref<8x784xf32, #tpu.memory_space<vmem>>, vector<8x784xf32>
    %1 = arith.truncf %0 : vector<8x784xf32> to vector<8x784xbf16>
    %c0_1 = arith.constant 0 : index
    %c0_2 = arith.constant 0 : index
    %2 = vector.load %arg2[%c0_1, %c0_2] : memref<784x128xbf16, #tpu.memory_space<vmem>>, vector<784x128xbf16>
    %cst = arith.constant dense<0.000000e+00> : vector<8x128xf32>
    %3 = tpu.matmul %1, %2, %cst {dimension_numbers = #tpu.dot_dimension_numbers<[1], [0], [0], [1], [0, 0, 1, 1], [], []>} : vector<8x784xbf16>, vector<784x128xbf16>, vector<8x128xf32> -> vector<8x128xf32>
    %c0_3 = arith.constant 0 : index
    %c0_4 = arith.constant 0 : index
    %4 = vector.load %arg3[%c0_3, %c0_4] : memref<1x128xf32, #tpu.memory_space<vmem>>, vector<1x128xf32>
    %5 = vector.broadcast %4 : vector<1x128xf32> to vector<8x128xf32>
    %6 = arith.addf %3, %5 : vector<8x128xf32>
    %cst_5 = arith.constant 0.000000e+00 : f32
    %7 = vector.broadcast %cst_5 : f32 to vector<8x128xf32>
    %8 = arith.maximumf %6, %7 : vector<8x128xf32>
    %9 = arith.truncf %8 : vector<8x128xf32> to vector<8x128xbf16>
    %c0_6 = arith.constant 0 : index
    %c0_7 = arith.constant 0 : index
    %10 = vector.load %arg4[%c0_6, %c0_7] : memref<128x128xbf16, #tpu.memory_space<vmem>>, vector<128x128xbf16>
    %cst_8 = arith.constant dense<0.000000e+00> : vector<8x128xf32>
    %11 = tpu.matmul %9, %10, %cst_8 {dimension_numbers = #tpu.dot_dimension_numbers<[1], [0], [0], [1], [0, 0, 1, 1], [], []>} : vector<8x128xbf16>, vector<128x128xbf16>, vector<8x128xf32> -> vector<8x128xf32>
    %c0_9 = arith.constant 0 : index
    %c0_10 = arith.constant 0 : index
    %12 = vector.load %arg5[%c0_9, %c0_10] : memref<1x128xf32, #tpu.memory_space<vmem>>, vector<1x128xf32>
    %13 = vector.broadcast %12 : vector<1x128xf32> to vector<8x128xf32>
    %14 = arith.addf %11, %13 : vector<8x128xf32>
    %cst_11 = arith.constant dense<0xFF800000> : vector<8xf32>
    %15 = vector.multi_reduction <maximumf>, %14, %cst_11 [1] : vector<8x128xf32> to vector<8xf32>
    %16 = vector.shape_cast %15 : vector<8xf32> to vector<8x1xf32>
    %17 = vector.broadcast %16 : vector<8x1xf32> to vector<8x128xf32>
    %18 = arith.subf %14, %17 : vector<8x128xf32>
    %19 = math.exp %18 : vector<8x128xf32>
    %cst_12 = arith.constant dense<0.000000e+00> : vector<8xf32>
    %20 = vector.multi_reduction <add>, %19, %cst_12 [1] : vector<8x128xf32> to vector<8xf32>
    %21 = vector.shape_cast %20 : vector<8xf32> to vector<8x1xf32>
    %22 = vector.broadcast %21 : vector<8x1xf32> to vector<8x128xf32>
    %23 = arith.divf %19, %22 : vector<8x128xf32>
    %24 = arith.truncf %23 : vector<8x128xf32> to vector<8x128xbf16>
    %c0_13 = arith.constant 0 : index
    %c0_14 = arith.constant 0 : index
    %25 = vector.load %arg6[%c0_13, %c0_14] : memref<8x128xbf16, #tpu.memory_space<vmem>>, vector<8x128xbf16>
    tpu.vector_store %arg6[%c0_13, %c0_14], %24 {strides = array<i32>} : memref<8x128xbf16, #tpu.memory_space<vmem>>, vector<8x128xbf16>,
    return
  }
  func.func @transform_0(%arg0: i32) -> (i32, i32) {
    %c0_i32 = arith.constant 0 : i32
    %c0_i32_0 = arith.constant 0 : i32
    return %arg0, %c0_i32 : i32, i32
  }
  func.func @transform_1(%arg0: i32) -> (i32, i32) {
    %c0_i32 = arith.constant 0 : i32
    %c0_i32_0 = arith.constant 0 : i32
    %c0_i32_1 = arith.constant 0 : i32
    return %c0_i32, %c0_i32_0 : i32, i32
  }
  func.func @transform_2(%arg0: i32) -> (i32, i32) {
    %c0_i32 = arith.constant 0 : i32
    %c0_i32_0 = arith.constant 0 : i32
    %c0_i32_1 = arith.constant 0 : i32
    return %c0_i32, %c0_i32_0 : i32, i32
  }
  func.func @transform_3(%arg0: i32) -> (i32, i32) {
    %c0_i32 = arith.constant 0 : i32
    %c0_i32_0 = arith.constant 0 : i32
    %c0_i32_1 = arith.constant 0 : i32
    return %c0_i32, %c0_i32_0 : i32, i32
  }
  func.func @transform_4(%arg0: i32) -> (i32, i32) {
    %c0_i32 = arith.constant 0 : i32
    %c0_i32_0 = arith.constant 0 : i32
    %c0_i32_1 = arith.constant 0 : i32
    return %c0_i32, %c0_i32_0 : i32, i32
  }
  func.func @transform_5(%arg0: i32) -> (i32, i32) {
    %c0_i32 = arith.constant 0 : i32
    %c0_i32_0 = arith.constant 0 : i32
    return %arg0, %c0_i32 : i32, i32
  }
}

</mosaic_0001>

<bundles_post_ra>
// kernel: tpu_custom_call.1
= control target key start
LH: loop header
LB: loop body
LE: loop exit
PB: predicated region body
PF: predicated region fallthrough
CT: control target
= control target key end

     0   :  { %10 = vsyncpa [#allocation3], 0  ;;  %s1215_s0 = inlined_call_operand.hbm [shape: f32[8,784], index: 0, kind: input, shape index: {}]   ;;  %s1216_s1 = inlined_call_operand.hbm [shape: bf16[784,128], index: 1, kind: input, shape index: {}]   ;;  %s1217_s2 = inlined_call_operand.vmem [shape: f32[1,128], index: 2, kind: input, shape index: {}]   ;;  %s1218_s3 = inlined_call_operand.hbm [shape: bf16[128,128], index: 3, kind: input, shape index: {}]   ;;  %s1219_s4 = inlined_call_operand.vmem [shape: f32[1,128], index: 4, kind: input, shape index: {}]   ;;  %s1220_s5 = inlined_call_operand.hbm [shape: bf16[8,128], index: 5, kind: output, shape index: {}]  }
   0x1   :  { %11 = vsyncpa [#allocation6], 0 }
   0x2   :  { %12 = vsyncpa [#allocation4], 0  ;;  %s1104_s18 = smov [#allocation5]   ;;  %s1010_s22 = scalar_lea.hbm %s1216_s1, 6272 }
   0x3   :  { %s28_s19 = sshll.u32 %s1104_s18, 4  ;;  %p1011_p0 = scmp.ne.s32.totalorder %s1216_s1, %s1010_s22  ;;  %s29_s19 = int_to_ptr.vmem [resolvable:$true] %s28_s19 }
   0x4   :  { %p1014_p1 = scmp.lt.u32.totalorder %s1010_s22, %s1216_s1 }
   0x6   :  { %p1016_p2 = pnand %p1014_p1, %p1011_p0 }
   0x8   :  { %1019 = shalt.err (!%p1016_p2)
}
   0x9   :  { %s1020_s27 = scalar_lea.vmem %s29_s19, 6272  ;;  %p1025_p4 = scmp.lt.s32.totalorder %s29_s19, %s29_s19 }
   0xa   :  { %p1021_p3 = scmp.ne.s32.totalorder %s29_s19, %s1020_s27  ;;  %p1026_p5 = scmp.lt.s32.totalorder %s1020_s27, %s1020_s27 }
   0xc   :  { %p1027_p6 = por %p1026_p5, %p1025_p4 }
   0xe   :  { %p1028_p7 = pnand %p1027_p6, %p1021_p3 }
  0x10   :  { %1031 = shalt.err (!%p1028_p7)
}
  0x11   :  { %s1105_s28 = smov 64   ;;  %s1106_s29 = smov 4  }
  0x12   :  { %34 = dma.hbm_to_vmem [thread:$0]  %s1216_s1, 6272, %s29_s19, [#allocation6], %s1105_s28, %s1105_s28, %s1106_s29  }
  0x13   :  { %s1107_s7 = smov [#allocation2]   ;;  %s1108_s9 = smov [#allocation7]  }
  0x14   :  { %s19_s8 = sshll.u32 %s1107_s7, 4  ;;  %s42_s10 = sshll.u32 %s1108_s9, 4  ;;  %s20_s8 = int_to_ptr.vmem [resolvable:$true] %s19_s8  ;;  %s43_s10 = int_to_ptr.vmem [resolvable:$true] %s42_s10 }
  0x15   :  { %s1032_s13 = scalar_lea.hbm %s1215_s0, 896 }
  0x16   :  { %p1033_p8 = scmp.ne.s32.totalorder %s1215_s0, %s1032_s13  ;;  %p1036_p9 = scmp.lt.u32.totalorder %s1032_s13, %s1215_s0 }
  0x18   :  { %p1038_p10 = pnand %p1036_p9, %p1033_p8 }
  0x1a   :  { %1041 = shalt.err (!%p1038_p10)
}
  0x1b   :  { %s1042_s1 = scalar_lea.vmem %s20_s8, 896  ;;  %p1047_p12 = scmp.lt.s32.totalorder %s20_s8, %s20_s8 }
  0x1c   :  { %p1043_p11 = scmp.ne.s32.totalorder %s20_s8, %s1042_s1  ;;  %p1048_p13 = scmp.lt.s32.totalorder %s1042_s1, %s1042_s1 }
  0x1e   :  { %p1049_p0 = por %p1048_p13, %p1047_p12 }
  0x20   :  { %p1050_p1 = pnand %p1049_p0, %p1043_p11 }
  0x22   :  { %1053 = shalt.err (!%p1050_p1)
}
  0x23   :  { %22 = dma.hbm_to_vmem [thread:$0]  %s1215_s0, 896, %s20_s8, [#allocation3]  }
  0x24   :  { %s1054_s22 = scalar_lea.hbm %s1218_s3, 1024 }
  0x25   :  { %p1055_p2 = scmp.ne.s32.totalorder %s1218_s3, %s1054_s22  ;;  %p1058_p3 = scmp.lt.u32.totalorder %s1054_s22, %s1218_s3 }
  0x27   :  { %p1060_p4 = pnand %p1058_p3, %p1055_p2 }
  0x29   :  { %1063 = shalt.err (!%p1060_p4)
}
  0x2a   :  { %s1064_s27 = scalar_lea.vmem %s43_s10, 1024  ;;  %p1069_p6 = scmp.lt.s32.totalorder %s43_s10, %s43_s10 }
  0x2b   :  { %p1065_p5 = scmp.ne.s32.totalorder %s43_s10, %s1064_s27  ;;  %p1070_p7 = scmp.lt.s32.totalorder %s1064_s27, %s1064_s27 }
  0x2d   :  { %p1071_p8 = por %p1070_p7, %p1069_p6 }
  0x2f   :  { %p1072_p9 = pnand %p1071_p8, %p1065_p5 }
  0x31   :  { %1075 = shalt.err (!%p1072_p9)
}
  0x32   :  { %48 = dma.hbm_to_vmem [thread:$0]  %s1218_s3, 1024, %s43_s10, [#allocation6], %s1105_s28, %s1105_s28, %s1106_s29  }
  0x33   :  { %1098 = dma.done.wait [#allocation3], 896  }
  0x34   :  { %1099 = vsyncadd [#allocation3], 4294966400 }
  0x35   :  { %1100 = dma.done.wait [#allocation6], 7296  }
  0x36   :  { %1101 = vsyncadd [#allocation6], 4294960000  ;;  %v949_v0 = vld [vmem:[#allocation5 + $0x40] sm:$0xff]   ;;  %v953_v4 = vld [vmem:[#allocation5 + $0x48] sm:$0xff]   ;;  %v1109_v44 = vmov 0.0   ;;  %vm1110_vm0 = vmmov 0  }
  0x37   :  { %v950_v1 = vld [vmem:[#allocation5] sm:$0xff]   ;;  %838 = vmatprep.subr.bf16.mxu0 %v949_v0  ;;  %v954_v5 = vld [vmem:[#allocation5 + $0x8] sm:$0xff]   ;;  %v957_v8 = vld [vmem:[#allocation5 + $0x50] sm:$0xff]   ;;  %vm474_vm1 = vcmask 130048   ;;  %s1111_s6 = smov [#allocation8]  }
  0x38   :  { %v951_v2 = vld [vmem:[#allocation5 + $0xc0] sm:$0xff]   ;;  %839 = vmatpush3.bf16.msra.mxu0 %v950_v1  ;;  %v955_v6 = vld [vmem:[#allocation5 + $0xc8] sm:$0xff]   ;;  %v958_v9 = vld [vmem:[#allocation5 + $0x10] sm:$0xff]   ;;  %s768_s7 = sshll.u32 %s1111_s6, 4  ;;  %s769_s7 = int_to_ptr.vmem [resolvable:$true] %s768_s7 }
  0x39   :  { %v952_v3 = vld [vmem:[#allocation5 + $0x80] sm:$0xff]   ;;  %860 = vmatprep.subr.bf16.mxu1 %v951_v2  ;;  %840 = vmatprep.subr.bf16.mxu0 %v953_v4  ;;  %v956_v7 = vld [vmem:[#allocation5 + $0x88] sm:$0xff]   ;;  %v959_v10 = vld [vmem:[#allocation5 + $0xd0] sm:$0xff]   ;;  %p1081_p11 = scmp.lt.s32.totalorder %s769_s7, %s769_s7 }
  0x3a   :  { %861 = vmatpush3.bf16.msra.mxu1 %v952_v3  ;;  %v960_v11 = vld [vmem:[#allocation5 + $0x90] sm:$0xff]   ;;  %v961_v12 = vld [vmem:[#allocation5 + $0x58] sm:$0xff]   ;;  %v965_v16 = vld [vmem:[#allocation5 + $0x60] sm:$0xff]  }
  0x3b   :  { %862 = vmatprep.subr.bf16.mxu1 %v955_v6  ;;  %v962_v13 = vld [vmem:[#allocation5 + $0x18] sm:$0xff]   ;;  %v966_v17 = vld [vmem:[#allocation5 + $0x20] sm:$0xff]   ;;  %v969_v20 = vld [vmem:[#allocation5 + $0x68] sm:$0xff]  }
  0x3c   :  { %841 = vmatpush3.bf16.msra.mxu0 %v954_v5  ;;  %v963_v14 = vld [vmem:[#allocation5 + $0xd8] sm:$0xff]   ;;  %v967_v18 = vld [vmem:[#allocation5 + $0xe0] sm:$0xff]   ;;  %v970_v21 = vld [vmem:[#allocation5 + $0x28] sm:$0xff]  }
  0x3d   :  { %842 = vmatprep.subr.bf16.mxu0 %v957_v8  ;;  %v964_v15 = vld [vmem:[#allocation5 + $0x98] sm:$0xff]   ;;  %v968_v19 = vld [vmem:[#allocation5 + $0xa0] sm:$0xff]   ;;  %v971_v22 = vld [vmem:[#allocation5 + $0xe8] sm:$0xff]  }
  0x3e   :  { %863 = vmatpush3.bf16.msra.mxu1 %v956_v7  ;;  %v972_v23 = vld [vmem:[#allocation5 + $0xa8] sm:$0xff]   ;;  %v973_v24 = vld [vmem:[#allocation5 + $0x70] sm:$0xff]   ;;  %v977_v28 = vld [vmem:[#allocation5 + $0x78] sm:$0xff]  }
  0x3f   :  { %864 = vmatprep.subr.bf16.mxu1 %v959_v10  ;;  %v974_v25 = vld [vmem:[#allocation5 + $0x30] sm:$0xff]   ;;  %v978_v29 = vld [vmem:[#allocation5 + $0x38] sm:$0xff]   ;;  %v61_v34 = vld [vmem:[#allocation2] sm:$0xff] }
  0x40   :  { %843 = vmatpush3.bf16.msra.mxu0 %v958_v9  ;;  %v975_v26 = vld [vmem:[#allocation5 + $0xf0] sm:$0xff]   ;;  %v979_v30 = vld [vmem:[#allocation5 + $0xf8] sm:$0xff]   ;;  %v68_v35 = vpack.c.bf16 %v61_v34, %v61_v34  ;;  %v981_v36 = vld [vmem:[#allocation5 + $0x140] sm:$0xff]  }
  0x41   :  { %844 = vmatprep.subr.bf16.mxu0 %v961_v12  ;;  %v976_v27 = vld [vmem:[#allocation5 + $0xb0] sm:$0xff]   ;;  %v980_v33 = vld [vmem:[#allocation5 + $0xb8] sm:$0xff]   ;;  %v64_v37 = vld [vmem:[#allocation2 + $0x18] sm:$0xff] }
  0x42   :  { %865 = vmatpush3.bf16.msra.mxu1 %v960_v11  ;;  %v62_v31 = vld [vmem:[#allocation2 + $0x8] sm:$0xff]  ;;  %v71_v38 = vpack.c.bf16 %v64_v37, %v64_v37  ;;  %v982_v39 = vld [vmem:[#allocation5 + $0x100] sm:$0xff]   ;;  %v63_v40 = vld [vmem:[#allocation2 + $0x10] sm:$0xff] }
  0x43   :  { %866 = vmatprep.subr.bf16.mxu1 %v963_v14  ;;  %v69_v32 = vpack.c.bf16 %v62_v31, %v62_v31  ;;  %v70_v41 = vpack.c.bf16 %v63_v40, %v63_v40  ;;  %v983_v42 = vld [vmem:[#allocation5 + $0x148] sm:$0xff]   ;;  %v985_v45 = vld [vmem:[#allocation5 + $0x150] sm:$0xff]   ;;  %v987_v47 = vld [vmem:[#allocation5 + $0x158] sm:$0xff]  }
  0x44   :  { %845 = vmatpush3.bf16.msra.mxu0 %v962_v13  ;;  %550 = vmatprep.mubr.bf16.mxu1 %v71_v38  ;;  %v984_v43 = vld [vmem:[#allocation5 + $0x108] sm:$0xff]   ;;  %v986_v46 = vld [vmem:[#allocation5 + $0x110] sm:$0xff]   ;;  %v988_v48 = vld [vmem:[#allocation5 + $0x118] sm:$0xff]  }
  0x45   :  { %846 = vmatprep.subr.bf16.mxu0 %v965_v16  ;;  %510 = vmatprep.mubr.bf16.mxu0 %v69_v32  ;;  %v989_v49 = vld [vmem:[#allocation5 + $0x160] sm:$0xff]   ;;  %v991_v51 = vld [vmem:[#allocation5 + $0x168] sm:$0xff]   ;;  %v66_v54 = vld [vmem:[#allocation2 + $0x28] sm:$0xff] }
  0x46   :  { %867 = vmatpush3.bf16.msra.mxu1 %v964_v15  ;;  %v990_v50 = vld [vmem:[#allocation5 + $0x120] sm:$0xff]   ;;  %v992_v52 = vld [vmem:[#allocation5 + $0x128] sm:$0xff]   ;;  %v993_v55 = vld [vmem:[#allocation5 + $0x170] sm:$0xff]   ;;  %v73_v56 = vpack.c.bf16 %v66_v54, %v66_v54 }
  0x47   :  { %868 = vmatprep.subr.bf16.mxu1 %v967_v18  ;;  %v997_v53 = vld [vmem:[#allocation5 + $0x180] sm:$0xff]   ;;  %v67_v57 = vld [vmem:[#allocation2 + $0x30] sm:$0xff]  ;;  %v994_v59 = vld [vmem:[#allocation5 + $0x130] sm:$0xff]  }
  0x48   :  { %847 = vmatpush3.bf16.msra.mxu0 %v966_v17  ;;  %v74_v58 = vpack.c.bf16 %v67_v57, %v67_v57  ;;  %v995_v60 = vld [vmem:[#allocation5 + $0x178] sm:$0xff]   ;;  %v65_v62 = vld [vmem:[#allocation2 + $0x20] sm:$0xff]  ;;  %v999_v1 = vld [vmem:[#allocation7 + $0x8] sm:$0xff]  }
  0x49   :  { %848 = vmatprep.subr.bf16.mxu0 %v969_v20  ;;  %v996_v61 = vld [vmem:[#allocation5 + $0x138] sm:$0xff]   ;;  %v72_v63 = vpack.c.bf16 %v65_v62, %v65_v62  ;;  %v998_v0 = vld [vmem:[#allocation7] sm:$0xff]   ;;  %v1001_v3 = vld [vmem:[#allocation7 + $0x18] sm:$0xff]  }
  0x4a   :  { %869 = vmatpush3.bf16.msra.mxu1 %v968_v19  ;;  %v1000_v2 = vld [vmem:[#allocation7 + $0x10] sm:$0xff]   ;;  %v1002_v4 = vld [vmem:[#allocation7 + $0x20] sm:$0xff]   ;;  %v1003_v5 = vld [vmem:[#allocation7 + $0x28] sm:$0xff]  }
  0x4b   :  { %870 = vmatprep.subr.bf16.mxu1 %v971_v22  ;;  %v1004_v6 = vld [vmem:[#allocation7 + $0x30] sm:$0xff]   ;;  %v1005_v7 = vld [vmem:[#allocation7 + $0x38] sm:$0xff]   ;;  %v778_v9 = vld [vmem:[%s1217_s2] ss:$0 sm:$0xff] }
  0x4c   :  { %849 = vmatpush3.bf16.msra.mxu0 %v970_v21  ;;  %v829_v34 = vld [vmem:[%s1219_s4] ss:$0 sm:$0xff]  ;;  %s1076_s4 = scalar_lea.vmem %s769_s7, 64 }
  0x4d   :  { %850 = vmatprep.subr.bf16.mxu0 %v973_v24  ;;  %p1077_p10 = scmp.ne.s32.totalorder %s769_s7, %s1076_s4  ;;  %p1082_p12 = scmp.lt.s32.totalorder %s1076_s4, %s1076_s4 }
  0x4e   :  { %871 = vmatpush3.bf16.msra.mxu1 %v972_v23 }
  0x4f   :  { %872 = vmatprep.subr.bf16.mxu1 %v975_v26  ;;  %p1083_p13 = por %p1082_p12, %p1081_p11 }
  0x50   :  { %851 = vmatpush3.bf16.msra.mxu0 %v974_v25 }
  0x51   :  { %852 = vmatprep.subr.bf16.mxu0 %v977_v28  ;;  %p1084_p0 = pnand %p1083_p13, %p1077_p10 }
  0x52   :  { %873 = vmatpush3.bf16.msra.mxu1 %v976_v27 }
  0x53   :  { %874 = vmatprep.subr.bf16.mxu1 %v979_v30 }
  0x54   :  { %853 = vmatpush3.bf16.msra.mxu0 %v978_v29 }
  0x55   :  { %882 = vmatprep.subr.bf16.mxu0 %v981_v36 }
  0x56   :  { %875 = vmatpush3.bf16.msra.mxu1 %v980_v33 }
  0x57   :  { %511 = vmatmul.mubr.bf16.vlgmr.msra.gmra.mrb[0].mxu0 %v68_v35  ;;  %915 = vmatprep.subr.bf16.mxu1 %v1109_v44 }
  0x58   :  { %883 = vmatpush3.bf16.msra.mxu0 %v982_v39  ;;  %590 = vmatprep.mubr.bf16.mxu0 %v73_v56 }
  0x59   :  { %551 = vmatmul.mubr.bf16.vlgmr.msra.gmra.mrb[0].mxu1 %v70_v41  ;;  %884 = vmatprep.subr.bf16.mxu0 %v983_v42 }
  0x5a   :  { %917 = vmatprep.mubr.msk.bf16.mxu1 %vm1110_vm0, %v1109_v44  ;;  %916 = vmatpush3.bf16.msra.mxu1 %v997_v53 }
  0x5b   :  { %921 = vmatprep.subr.bf16.mxu1 %v1109_v44 }
  0x5c   :  { %885 = vmatpush3.bf16.msra.mxu0 %v984_v43 }
  0x5d   :  { %886 = vmatprep.subr.bf16.mxu0 %v985_v45 }
  0x60   :  { %887 = vmatpush3.bf16.msra.mxu0 %v986_v46 }
  0x61   :  { %888 = vmatprep.subr.bf16.mxu0 %v987_v47  ;;  %918 = vmatmul.mubr.msk.bf16.vlgmr.msra.gmra.mrb[4].mxu1 %vm474_vm1, %v74_v58 }
  0x62   :  { %937 = vmatprep.mubr.msk.bf16.mxu1 %vm1110_vm0, %v1109_v44  ;;  %922 = vmatpush3.bf16.msra.mxu1 %v998_v0 }
  0x63   :  { %923 = vmatprep.subr.bf16.mxu1 %v1109_v44 }
  0x64   :  { %889 = vmatpush3.bf16.msra.mxu0 %v988_v48 }
  0x65   :  { %890 = vmatprep.subr.bf16.mxu0 %v989_v49 }
  0x66   :  { %924 = vmatpush3.bf16.msra.mxu1 %v999_v1 }
  0x67   :  { %925 = vmatprep.subr.bf16.mxu1 %v1109_v44 }
  0x68   :  { %891 = vmatpush3.bf16.msra.mxu0 %v990_v50 }
  0x69   :  { %892 = vmatprep.subr.bf16.mxu0 %v991_v51 }
  0x6a   :  { %926 = vmatpush3.bf16.msra.mxu1 %v1000_v2 }
  0x6b   :  { %927 = vmatprep.subr.bf16.mxu1 %v1109_v44 }
  0x6c   :  { %893 = vmatpush3.bf16.msra.mxu0 %v992_v52 }
  0x6d   :  { %894 = vmatprep.subr.bf16.mxu0 %v993_v55 }
  0x6e   :  { %928 = vmatpush3.bf16.msra.mxu1 %v1001_v3 }
  0x6f   :  { %929 = vmatprep.subr.bf16.mxu1 %v1109_v44 }
  0x70   :  { %895 = vmatpush3.bf16.msra.mxu0 %v994_v59 }
  0x71   :  { %896 = vmatprep.subr.bf16.mxu0 %v995_v60 }
  0x72   :  { %930 = vmatpush3.bf16.msra.mxu1 %v1002_v4 }
  0x73   :  { %931 = vmatprep.subr.bf16.mxu1 %v1109_v44 }
  0x74   :  { %897 = vmatpush3.bf16.msra.mxu0 %v996_v61 }
  0x76   :  { %932 = vmatpush3.bf16.msra.mxu1 %v1003_v5 }
  0x77   :  { %591 = vmatmul.mubr.bf16.vlgmr.msra.gmra.mrb[4].mxu0 %v72_v63  ;;  %933 = vmatprep.subr.bf16.mxu1 %v1109_v44 }
  0x7a   :  { %934 = vmatpush3.bf16.msra.mxu1 %v1004_v6 }
  0x7b   :  { %935 = vmatprep.subr.bf16.mxu1 %v1109_v44 }
  0x7e   :  { %936 = vmatpush3.bf16.msra.mxu1 %v1005_v7 }
 0x12a   :  { %v854_v8 = vpop.f32.mrb[0].mxu0 }
 0x12b   :  { %v855_v10 = vpop.f32.mrb[1].mxu0 }
 0x12c   :  { %v856_v11 = vadd.f32 %v855_v10, %v854_v8  ;;  %v857_v12 = vpop.f32.mrb[2].mxu0  ;;  %v876_v13 = vpop.f32.mrb[0].mxu1 }
 0x12d   :  { %v858_v14 = vpop.f32.mrb[3].mxu0  ;;  %v877_v16 = vpop.f32.mrb[1].mxu1 }
 0x12e   :  { %v513_v15 = vadd.f32 %v856_v11, %v778_v9  ;;  %v878_v17 = vadd.f32 %v877_v16, %v876_v13  ;;  %v879_v18 = vpop.f32.mrb[2].mxu1 }
 0x12f   :  { %v880_v19 = vpop.f32.mrb[3].mxu1 }
 0x130   :  { %v553_v20 = vadd.f32 %v878_v17, %v513_v15 }
 0x134   :  { %v632_v21 = vpop.f32.mrb[4].mxu1 }
 0x135   :  { %v919_v22 = vpop.f32.mrb[5].mxu1 }
 0x136   :  { %v635_v23 = vpop.f32.mrb[6].mxu1 }
 0x137   :  { %v920_v24 = vpop.f32.mrb[7].mxu1 }
 0x14a   :  { %v898_v25 = vpop.f32.mrb[4].mxu0 }
 0x14b   :  { %v899_v26 = vpop.f32.mrb[5].mxu0 }
 0x14c   :  { %v900_v27 = vadd.f32 %v899_v26, %v898_v25  ;;  %v901_v28 = vpop.f32.mrb[6].mxu0 }
 0x14d   :  { %v902_v29 = vpop.f32.mrb[7].mxu0 }
 0x14e   :  { %v593_v30 = vadd.f32 %v900_v27, %v553_v20 }
 0x150   :  { %v633_v31 = vadd.f32 %v632_v21, %v593_v30 }
 0x152   :  { %v638_v32 = vmax.f32 %v633_v31, 0.0 }
 0x154   :  { %v639_v33 = vpack.c.bf16 %v638_v32, %v638_v32 }
 0x156   :  { %938 = vmatmul.mubr.bf16.vlgmr.msra.gmra.mrb[8].mxu1 %v639_v33 }
 0x229   :  { %v745_v35 = vpop.f32.mrb[8].mxu1 }
 0x22a   :  { %v746_v36 = vadd.f32 %v829_v34, %v745_v35  ;;  %v939_v37 = vpop.f32.mrb[9].mxu1 }
 0x22b   :  { %v748_v38 = vpop.f32.mrb[10].mxu1 }
 0x22c   :  { %751 = vmax.xlane.f32.xlu0 %v746_v36  ;;  %v940_v39 = vpop.f32.mrb[11].mxu1 }
 0x2b9   :  { %v752_v40 = vpop.xlane.xlu0 %751 }
 0x2ba   :  { %v753_v41 = vsub.f32 %v746_v36, %v752_v40 }
 0x2bc   :  { %v754_v42 = vmul.f32 1.442695, %v753_v41 }
 0x2be   :  { %1006 = vpow2.f32 %v754_v42 }
 0x2c8   :  { %v1007_v43 = vpop.eup %1006 }
 0x2c9   :  { %756 = vadd.xlane.f32.xlu0 %v1007_v43 }
 0x356   :  { %v757_v44 = vpop.xlane.xlu0 %756 }
 0x357   :  { %1008 = vrcp.f32 %v757_v44 }
 0x361   :  { %v1009_v45 = vpop.eup %1008 }
 0x362   :  { %v759_v46 = vmul.f32 %v1009_v45, %v1007_v43 }
 0x364   :  { %v760_v47 = vpack.c.bf16 %v759_v46, %v759_v46 }
 0x366   :  { %761 = vst [vmem:[#allocation8] sm:$0xf] %v760_v47 }
 0x367   :  { %1087 = shalt.err (!%p1084_p0)
}
 0x368   :  { %s1088_s10 = scalar_lea.hbm %s1220_s5, 64 }
 0x369   :  { %p1089_p1 = scmp.ne.s32.totalorder %s1220_s5, %s1088_s10  ;;  %p1092_p2 = scmp.lt.u32.totalorder %s1088_s10, %s1220_s5 }
 0x36b   :  { %p1094_p3 = pnand %p1092_p2, %p1089_p1 }
 0x36d   :  { %1097 = shalt.err (!%p1094_p3)
}
 0x36e   :  { %771 = dma.vmem_to_hbm [thread:$0]  %s769_s7, 64, %s1220_s5, [#allocation4]  }
 0x36f   :  { %1102 = dma.done.wait [#allocation4], 64  }
 0x370   :  { %1103 = vsyncadd [#allocation4], 4294967232 }
 0x371   :  { %775 = vsyncpa [#allocation3], 1 }
 0x372   :  { %776 = vsyncpa [#allocation6], 1 }
 0x373   :  { %777 = vsyncpa [#allocation4], 1 }

</bundles_post_ra>
